<compile_context>
chip_gen: v7x
topology: tpu7x:2x2x1
jax: 0.10.0
libtpu: 0.0.40
codegen_flags: <defaults>
</compile_context>

<pallas_src>
import math

import jax
import jax.numpy as jnp
from jax import lax
from jax.experimental import pallas as pl
from jax.experimental.pallas import tpu as pltpu

EPS = 1e-6

# A . Bᵀ contraction (contract the last dim of both operands) -> single MXU op,
# no materialized transpose.
_NT_DIMS = (((1,), (1,)), ((), ()))


def _flow_kernel(z_ref, w_ref, u_ref, b_ref, z_out_ref, logdet_ref):
    # z_ref      : [B, D] VMEM  (HBM buffer aliased with z_out)
    # w_ref      : [K, D] VMEM  planar-flow w_k
    # u_ref      : [K, D] VMEM  raw u_k (reparameterized in the prologue)
    # b_ref      : [1, K] VMEM  biases
    # z_out_ref  : [B, D] VMEM
    # logdet_ref : [B, K] VMEM
    z0 = z_ref[...]                                                    # [B, D]
    w = w_ref[...]                                                     # [K, D]
    u = u_ref[...]                                                     # [K, D]
    num_bij = w.shape[0]

    # ---------------- Prologue: parameter-only work, off the serial path -------
    # Invertibility reparameterization: u_hat = u + (softplus(w.u) - 1 - w.u) w/||w||^2
    wu = jnp.sum(w * u, axis=-1, keepdims=True)                        # [K, 1]
    softplus_wu = jnp.maximum(wu, 0.0) + jnp.log(1.0 + jnp.exp(-jnp.abs(wu)))
    u_hat = u + (softplus_wu - 1.0 - wu) * w / jnp.sum(
        w * w, axis=-1, keepdims=True)                                 # [K, D]

    # L0[b, j] = z0_b . w_j ;  Gt[k, j] = u_hat_k . w_j   (Gram matrix)
    L0 = lax.dot_general(z0, w, _NT_DIMS,
                         preferred_element_type=jnp.float32)           # [B, K]
    Gt = lax.dot_general(u_hat, w, _NT_DIMS,
                         preferred_element_type=jnp.float32)           # [K, K]

    # diag[0, k] = w_k . u_hat_k laid out as a [1, K] row (mask + sublane reduce).
    rows = lax.broadcasted_iota(jnp.int32, (num_bij, num_bij), 0)
    cols = lax.broadcasted_iota(jnp.int32, (num_bij, num_bij), 1)
    diag = jnp.sum(jnp.where(rows == cols, Gt, 0.0),
                   axis=0, keepdims=True)                              # [1, K]

    # ---------------- Serial chain: K scalar tanh + K-wide FMAs only -----------
    # lin[:, k] holds w_k . z_k + b_k, maintained incrementally via Gt.
    lin = L0 + b_ref[...]                                              # [B, K]
    h_cols = []
    for k in range(num_bij):                                           # static unroll
        h_k = jnp.tanh(lin[:, k:k + 1])                                # [B, 1] EUP
        h_cols.append(h_k)
        if k + 1 < num_bij:
            # Columns <= k are never read again, so the full-row FMA is safe.
            lin = lin + h_k * Gt[k:k + 1, :]                           # [B, K] VPU

    # ---------------- Epilogue: one log, one store, one D-wide reconstruction --
    h_mat = jnp.concatenate(h_cols, axis=1)                            # [B, K]
    psi = (1.0 - h_mat * h_mat) * diag                                 # [B, K]
    # NOTE: EPS inside the log matches the reference module's convention
    # (floors log|det| near singular Jacobians).
    logdet_ref[...] = jnp.log(jnp.abs(1.0 + psi) + EPS)                # single store
    z_out_ref[...] = z0 + jnp.dot(h_mat, u_hat,
                                  preferred_element_type=jnp.float32)  # [B, D]


@jax.jit
def normalizing_flow(z, w, u, b):
    """z: [B, D]; w, u: [K, D]; b: [K]  ->  (z_out [B, D], log_det [B, K])."""
    B, D = z.shape
    K = w.shape[0]

    z_out, log_det = pl.pallas_call(
        _flow_kernel,
        out_shape=(
            jax.ShapeDtypeStruct((B, D), jnp.float32),
            jax.ShapeDtypeStruct((B, K), jnp.float32),
        ),
        in_specs=[
            pl.BlockSpec(memory_space=pltpu.MemorySpace.VMEM),   # z  [B, D]
            pl.BlockSpec(memory_space=pltpu.MemorySpace.VMEM),   # w  [K, D]
            pl.BlockSpec(memory_space=pltpu.MemorySpace.VMEM),   # u  [K, D]
            pl.BlockSpec(memory_space=pltpu.MemorySpace.VMEM),   # b  [1, K]
        ],
        out_specs=(
            pl.BlockSpec(memory_space=pltpu.MemorySpace.VMEM),   # z_out   [B, D]
            pl.BlockSpec(memory_space=pltpu.MemorySpace.VMEM),   # log_det [B, K]
        ),
        input_output_aliases={0: 0},                             # donate z -> z_out
    )(z, w, u, b.reshape(1, K))
    return z_out, log_det


def _reference(z, w, u, b):
    """Pure-JAX reference of the same chained planar flow (sequential form)."""
    K = w.shape[0]
    logdets = []
    for k in range(K):
        wk, uk, bk = w[k], u[k], b[k]
        wu = jnp.sum(wk * uk)
        u_hat = uk + (jax.nn.softplus(wu) - 1.0 - wu) * wk / jnp.sum(wk * wk)
        lin = z @ wk + bk                                    # [B]
        h = jnp.tanh(lin)[:, None]                           # [B, 1]
        psi_u = (1.0 - h * h) * jnp.sum(wk * u_hat)          # [B, 1]
        logdets.append(jnp.log(jnp.abs(1.0 + psi_u) + EPS)[:, 0])
        z = z + u_hat[None, :] * h
    return z, jnp.stack(logdets, axis=-1)                    # [B, D], [B, K]


if __name__ == "__main__":
    # Module config: input_shape=(4, 8, 8) -> D = 256; f_blocks has 2 planar
    # blocks, length_flow = 3 -> K = 6 bijectors total.
    B = 2
    input_shape = (4, 8, 8)
    D = math.prod(input_shape)
    n_fblocks, length_flow = 2, 3
    K = n_fblocks * length_flow

    key = jax.random.PRNGKey(0)
    kz, kw, ku, kb = jax.random.split(key, 4)
    z = jax.random.normal(kz, (B, D), dtype=jnp.float32)
    w = 0.1 * jax.random.normal(kw, (K, D), dtype=jnp.float32)
    u = 0.1 * jax.random.normal(ku, (K, D), dtype=jnp.float32)
    b = 0.1 * jax.random.normal(kb, (K,), dtype=jnp.float32)

    z_ref, log_det_ref = _reference(z, w, u, b)

    z_out, log_det = jax.block_until_ready(normalizing_flow(z, w, u, b))

    assert jnp.allclose(z_out, z_ref, rtol=1e-4, atol=1e-4), "z mismatch"
    assert jnp.allclose(log_det, log_det_ref, rtol=1e-4, atol=1e-4), "logdet mismatch"

    print("KERNEL_OK")
</pallas_src>

<mosaic_0001>
module attributes {stable_mosaic.version = 11 : i64} {
  func.func @_flow_kernel(%arg0: memref<2x256xf32, #tpu.memory_space<vmem>>, %arg1: memref<6x256xf32, #tpu.memory_space<vmem>>, %arg2: memref<6x256xf32, #tpu.memory_space<vmem>>, %arg3: memref<1x6xf32, #tpu.memory_space<vmem>>, %arg4: memref<2x256xf32, #tpu.memory_space<vmem>>, %arg5: memref<2x6xf32, #tpu.memory_space<vmem>>) attributes {dimension_semantics = [], scalar_prefetch = 0 : i64, scratch_operands = 0 : i64, tpu.core_type = #tpu.core_type<tc>} {
    %c0 = arith.constant 0 : index
    %c0_0 = arith.constant 0 : index
    %0 = vector.load %arg0[%c0, %c0_0] : memref<2x256xf32, #tpu.memory_space<vmem>>, vector<2x256xf32>
    %c0_1 = arith.constant 0 : index
    %c0_2 = arith.constant 0 : index
    %1 = vector.load %arg1[%c0_1, %c0_2] : memref<6x256xf32, #tpu.memory_space<vmem>>, vector<6x256xf32>
    %c0_3 = arith.constant 0 : index
    %c0_4 = arith.constant 0 : index
    %2 = vector.load %arg2[%c0_3, %c0_4] : memref<6x256xf32, #tpu.memory_space<vmem>>, vector<6x256xf32>
    %3 = arith.mulf %1, %2 : vector<6x256xf32>
    %cst = arith.constant dense<0.000000e+00> : vector<6xf32>
    %4 = vector.multi_reduction <add>, %3, %cst [1] : vector<6x256xf32> to vector<6xf32>
    %5 = vector.shape_cast %4 : vector<6xf32> to vector<6x1xf32>
    %cst_5 = arith.constant 0.000000e+00 : f32
    %6 = vector.broadcast %cst_5 : f32 to vector<6x1xf32>
    %7 = arith.maximumf %5, %6 : vector<6x1xf32>
    %8 = math.absf %5 : vector<6x1xf32>
    %cst_6 = arith.constant 0.000000e+00 : f32
    %9 = vector.broadcast %cst_6 : f32 to vector<6x1xf32>
    %10 = arith.subf %9, %8 : vector<6x1xf32>
    %11 = math.exp %10 : vector<6x1xf32>
    %cst_7 = arith.constant 1.000000e+00 : f32
    %12 = vector.broadcast %cst_7 : f32 to vector<6x1xf32>
    %13 = arith.addf %12, %11 : vector<6x1xf32>
    %14 = math.log %13 : vector<6x1xf32>
    %15 = arith.addf %7, %14 : vector<6x1xf32>
    %cst_8 = arith.constant 1.000000e+00 : f32
    %16 = vector.broadcast %cst_8 : f32 to vector<6x1xf32>
    %17 = arith.subf %15, %16 : vector<6x1xf32>
    %18 = arith.subf %17, %5 : vector<6x1xf32>
    %19 = vector.broadcast %18 : vector<6x1xf32> to vector<6x256xf32>
    %20 = arith.mulf %19, %1 : vector<6x256xf32>
    %21 = arith.mulf %1, %1 : vector<6x256xf32>
    %cst_9 = arith.constant dense<0.000000e+00> : vector<6xf32>
    %22 = vector.multi_reduction <add>, %21, %cst_9 [1] : vector<6x256xf32> to vector<6xf32>
    %23 = vector.shape_cast %22 : vector<6xf32> to vector<6x1xf32>
    %24 = vector.broadcast %23 : vector<6x1xf32> to vector<6x256xf32>
    %25 = arith.divf %20, %24 : vector<6x256xf32>
    %26 = arith.addf %2, %25 : vector<6x256xf32>
    %cst_10 = arith.constant dense<0.000000e+00> : vector<2x6xf32>
    %27 = tpu.matmul %0, %1, %cst_10 {dimension_numbers = #tpu.dot_dimension_numbers<[1], [1], [0], [0], [0, 0, 1, 0], [], []>} : vector<2x256xf32>, vector<6x256xf32>, vector<2x6xf32> -> vector<2x6xf32>
    %cst_11 = arith.constant dense<0.000000e+00> : vector<6x6xf32>
    %28 = tpu.matmul %26, %1, %cst_11 {dimension_numbers = #tpu.dot_dimension_numbers<[1], [1], [0], [0], [0, 0, 1, 0], [], []>} : vector<6x256xf32>, vector<6x256xf32>, vector<6x6xf32> -> vector<6x6xf32>
    %29 = tpu.iota {dimensions = array<i32: 0>} : vector<6x6xi32>
    %30 = tpu.iota {dimensions = array<i32: 1>} : vector<6x6xi32>
    %31 = arith.cmpi eq, %29, %30 : vector<6x6xi32>
    %cst_12 = arith.constant 0.000000e+00 : f32
    %32 = vector.broadcast %cst_12 : f32 to vector<6x6xf32>
    %33 = arith.select %31, %28, %32 : vector<6x6xi1>, vector<6x6xf32>
    %cst_13 = arith.constant dense<0.000000e+00> : vector<6xf32>
    %34 = vector.multi_reduction <add>, %33, %cst_13 [0] : vector<6x6xf32> to vector<6xf32>
    %35 = vector.shape_cast %34 : vector<6xf32> to vector<1x6xf32>
    %c0_14 = arith.constant 0 : index
    %c0_15 = arith.constant 0 : index
    %36 = vector.load %arg3[%c0_14, %c0_15] : memref<1x6xf32, #tpu.memory_space<vmem>>, vector<1x6xf32>
    %37 = vector.broadcast %36 : vector<1x6xf32> to vector<2x6xf32>
    %38 = arith.addf %27, %37 : vector<2x6xf32>
    %39 = vector.extract_strided_slice %38 {offsets = [0, 0], sizes = [2, 1], strides = [1, 1]} : vector<2x6xf32> to vector<2x1xf32>
    %40 = math.tanh %39 : vector<2x1xf32>
    %41 = vector.extract_strided_slice %28 {offsets = [0, 0], sizes = [1, 6], strides = [1, 1]} : vector<6x6xf32> to vector<1x6xf32>
    %42 = vector.broadcast %40 : vector<2x1xf32> to vector<2x6xf32>
    %43 = vector.broadcast %41 : vector<1x6xf32> to vector<2x6xf32>
    %44 = arith.mulf %42, %43 : vector<2x6xf32>
    %45 = arith.addf %38, %44 : vector<2x6xf32>
    %46 = vector.extract_strided_slice %45 {offsets = [0, 1], sizes = [2, 1], strides = [1, 1]} : vector<2x6xf32> to vector<2x1xf32>
    %47 = math.tanh %46 : vector<2x1xf32>
    %48 = vector.extract_strided_slice %28 {offsets = [1, 0], sizes = [1, 6], strides = [1, 1]} : vector<6x6xf32> to vector<1x6xf32>
    %49 = vector.broadcast %47 : vector<2x1xf32> to vector<2x6xf32>
    %50 = vector.broadcast %48 : vector<1x6xf32> to vector<2x6xf32>
    %51 = arith.mulf %49, %50 : vector<2x6xf32>
    %52 = arith.addf %45, %51 : vector<2x6xf32>
    %53 = vector.extract_strided_slice %52 {offsets = [0, 2], sizes = [2, 1], strides = [1, 1]} : vector<2x6xf32> to vector<2x1xf32>
    %54 = math.tanh %53 : vector<2x1xf32>
    %55 = vector.extract_strided_slice %28 {offsets = [2, 0], sizes = [1, 6], strides = [1, 1]} : vector<6x6xf32> to vector<1x6xf32>
    %56 = vector.broadcast %54 : vector<2x1xf32> to vector<2x6xf32>
    %57 = vector.broadcast %55 : vector<1x6xf32> to vector<2x6xf32>
    %58 = arith.mulf %56, %57 : vector<2x6xf32>
    %59 = arith.addf %52, %58 : vector<2x6xf32>
    %60 = vector.extract_strided_slice %59 {offsets = [0, 3], sizes = [2, 1], strides = [1, 1]} : vector<2x6xf32> to vector<2x1xf32>
    %61 = math.tanh %60 : vector<2x1xf32>
    %62 = vector.extract_strided_slice %28 {offsets = [3, 0], sizes = [1, 6], strides = [1, 1]} : vector<6x6xf32> to vector<1x6xf32>
    %63 = vector.broadcast %61 : vector<2x1xf32> to vector<2x6xf32>
    %64 = vector.broadcast %62 : vector<1x6xf32> to vector<2x6xf32>
    %65 = arith.mulf %63, %64 : vector<2x6xf32>
    %66 = arith.addf %59, %65 : vector<2x6xf32>
    %67 = vector.extract_strided_slice %66 {offsets = [0, 4], sizes = [2, 1], strides = [1, 1]} : vector<2x6xf32> to vector<2x1xf32>
    %68 = math.tanh %67 : vector<2x1xf32>
    %69 = vector.extract_strided_slice %28 {offsets = [4, 0], sizes = [1, 6], strides = [1, 1]} : vector<6x6xf32> to vector<1x6xf32>
    %70 = vector.broadcast %68 : vector<2x1xf32> to vector<2x6xf32>
    %71 = vector.broadcast %69 : vector<1x6xf32> to vector<2x6xf32>
    %72 = arith.mulf %70, %71 : vector<2x6xf32>
    %73 = arith.addf %66, %72 : vector<2x6xf32>
    %74 = vector.extract_strided_slice %73 {offsets = [0, 5], sizes = [2, 1], strides = [1, 1]} : vector<2x6xf32> to vector<2x1xf32>
    %75 = math.tanh %74 : vector<2x1xf32>
    %76 = tpu.concatenate %40, %47, %54, %61, %68, %75 in 1 : vector<2x1xf32>, vector<2x1xf32>, vector<2x1xf32>, vector<2x1xf32>, vector<2x1xf32>, vector<2x1xf32> -> vector<2x6xf32>
    %77 = arith.mulf %76, %76 : vector<2x6xf32>
    %cst_16 = arith.constant 1.000000e+00 : f32
    %78 = vector.broadcast %cst_16 : f32 to vector<2x6xf32>
    %79 = arith.subf %78, %77 : vector<2x6xf32>
    %80 = vector.broadcast %35 : vector<1x6xf32> to vector<2x6xf32>
    %81 = arith.mulf %79, %80 : vector<2x6xf32>
    %cst_17 = arith.constant 1.000000e+00 : f32
    %82 = vector.broadcast %cst_17 : f32 to vector<2x6xf32>
    %83 = arith.addf %82, %81 : vector<2x6xf32>
    %84 = math.absf %83 : vector<2x6xf32>
    %cst_18 = arith.constant 9.99999997E-7 : f32
    %85 = vector.broadcast %cst_18 : f32 to vector<2x6xf32>
    %86 = arith.addf %84, %85 : vector<2x6xf32>
    %87 = math.log %86 : vector<2x6xf32>
    %c0_19 = arith.constant 0 : index
    %c0_20 = arith.constant 0 : index
    %88 = vector.load %arg5[%c0_19, %c0_20] : memref<2x6xf32, #tpu.memory_space<vmem>>, vector<2x6xf32>
    tpu.vector_store %arg5[%c0_19, %c0_20], %87 {strides = array<i32>} : memref<2x6xf32, #tpu.memory_space<vmem>>, vector<2x6xf32>,
    %cst_21 = arith.constant dense<0.000000e+00> : vector<2x256xf32>
    %89 = tpu.matmul %76, %26, %cst_21 {dimension_numbers = #tpu.dot_dimension_numbers<[1], [0], [0], [1], [0, 0, 1, 1], [], []>} : vector<2x6xf32>, vector<6x256xf32>, vector<2x256xf32> -> vector<2x256xf32>
    %90 = arith.addf %0, %89 : vector<2x256xf32>
    %c0_22 = arith.constant 0 : index
    %c0_23 = arith.constant 0 : index
    %91 = vector.load %arg4[%c0_22, %c0_23] : memref<2x256xf32, #tpu.memory_space<vmem>>, vector<2x256xf32>
    tpu.vector_store %arg4[%c0_22, %c0_23], %90 {strides = array<i32>} : memref<2x256xf32, #tpu.memory_space<vmem>>, vector<2x256xf32>,
    return
  }
}

</mosaic_0001>

<bundles_post_ra>
// kernel: normalizing_flow.1
= control target key start
LH: loop header
LB: loop body
LE: loop exit
PB: predicated region body
PF: predicated region fallthrough
CT: control target
= control target key end

     0   :  { %11 = vsyncpa [#allocation3], 0  ;;  %s721_s0 = inlined_call_operand.hbm [shape: f32[2,256], index: 0, kind: input, shape index: {}, may-alias: {0,4}]   ;;  %s722_s1 = inlined_call_operand.hbm [shape: f32[6,256], index: 1, kind: input, shape index: {}]   ;;  %s723_s2 = inlined_call_operand.vmem [shape: f32[6,256], index: 2, kind: input, shape index: {}]   ;;  %s724_s3 = inlined_call_operand.vmem [shape: f32[1,6], index: 3, kind: input, shape index: {}]   ;;  %s725_s4 = inlined_call_operand.hbm [shape: f32[2,256], index: 4, kind: output, shape index: {0}, may-alias: {0,4}]   ;;  %s726_s5 = inlined_call_operand.hbm [shape: f32[2,6], index: 5, kind: output, shape index: {1}]  }
   0x1   :  { %12 = vsyncpa [#allocation6], 0 }
   0x2   :  { %13 = vsyncpa [#allocation4], 0 }
   0x3   :  { %14 = vsyncpa [#allocation9], 0  ;;  %s598_s18 = smov [#allocation2]   ;;  %s599_s20 = smov [#allocation5]  }
   0x4   :  { %s21_s19 = sshll.u32 %s598_s18, 4  ;;  %s31_s21 = sshll.u32 %s599_s20, 4  ;;  %s22_s19 = int_to_ptr.vmem [resolvable:$true] %s21_s19  ;;  %s32_s21 = int_to_ptr.vmem [resolvable:$true] %s31_s21 }
   0x5   :  { %s502_s24 = scalar_lea.hbm %s721_s0, 64 }
   0x6   :  { %p503_p0 = scmp.ne.s32.totalorder %s721_s0, %s502_s24  ;;  %p506_p1 = scmp.lt.u32.totalorder %s502_s24, %s721_s0 }
   0x8   :  { %p508_p2 = pnand %p506_p1, %p503_p0 }
   0xa   :  { %511 = shalt.err (!%p508_p2)
}
   0xb   :  { %s512_s29 = scalar_lea.vmem %s22_s19, 64  ;;  %p517_p4 = scmp.lt.s32.totalorder %s22_s19, %s22_s19 }
   0xc   :  { %p513_p3 = scmp.ne.s32.totalorder %s22_s19, %s512_s29  ;;  %p518_p5 = scmp.lt.s32.totalorder %s512_s29, %s512_s29 }
   0xe   :  { %p519_p6 = por %p518_p5, %p517_p4 }
  0x10   :  { %p520_p7 = pnand %p519_p6, %p513_p3 }
  0x12   :  { %523 = shalt.err (!%p520_p7)
}
  0x13   :  { %24 = dma.hbm_to_vmem [thread:$0]  %s721_s0, 64, %s22_s19, [#allocation3]  }
  0x14   :  { %s524_s9 = scalar_lea.hbm %s722_s1, 256 }
  0x15   :  { %p525_p8 = scmp.ne.s32.totalorder %s722_s1, %s524_s9  ;;  %p528_p9 = scmp.lt.u32.totalorder %s524_s9, %s722_s1 }
  0x17   :  { %p530_p10 = pnand %p528_p9, %p525_p8 }
  0x19   :  { %533 = shalt.err (!%p530_p10)
}
  0x1a   :  { %s534_s14 = scalar_lea.vmem %s32_s21, 256  ;;  %p539_p12 = scmp.lt.s32.totalorder %s32_s21, %s32_s21 }
  0x1b   :  { %p535_p11 = scmp.ne.s32.totalorder %s32_s21, %s534_s14  ;;  %p540_p13 = scmp.lt.s32.totalorder %s534_s14, %s534_s14 }
  0x1d   :  { %p541_p0 = por %p540_p13, %p539_p12 }
  0x1f   :  { %p542_p1 = pnand %p541_p0, %p535_p11 }
  0x21   :  { %545 = shalt.err (!%p542_p1)
}
  0x22   :  { %34 = dma.hbm_to_vmem [thread:$0]  %s722_s1, 256, %s32_s21, [#allocation6]  }
  0x23   :  { %590 = dma.done.wait [#allocation3], 64  }
  0x24   :  { %591 = vsyncadd [#allocation3], 4294967232 }
  0x25   :  { %592 = dma.done.wait [#allocation6], 256  }
  0x26   :  { %593 = vsyncadd [#allocation6], 4294967040  ;;  %v153_v0 = vlaneseq  ;;  %v600_v1 = vmov 1983009808   ;;  %vm52_vm0 = vcmask 1045504   ;;  %v601_v23 = vmov 0  }
  0x27   :  { %v176_v2 = vunpack.c.l.s4 %v600_v1  ;;  %v46_v6 = vld [vmem:[#allocation5] sm:$0x3f]  ;;  %v47_v7 = vld [vmem:[#allocation5 + $0x8] sm:$0x3f]  ;;  %v49_v9 = vld [vmem:[%s723_s2 + $0x8] sm:$0x3f]  ;;  %476 = vset.pattern.permute.xlu1 %v601_v23 }
  0x28   :  { %v664_v3 = vshrl.u32 %v153_v0, 7  ;;  %v48_v8 = vld [vmem:[%s723_s2] sm:$0x3f]  ;;  %v71_v11 = vmul.f32 %v46_v6, %v46_v6  ;;  %v72_v12 = vmul.f32 %v47_v7, %v47_v7  ;;  %185 = vmatprep.subr.mxu1 %v47_v7  ;;  %v675_v13 = vld [vmem:[#allocation2] sm:$0xf]  ;;  %83 = vmatprep.subr.mxu0 %v47_v7  ;;  %v51_v14 = vmul.f32 %v49_v9, %v47_v7 }
  0x29   :  { %v177_v4 = vunpack.c.0.s8 %v176_v2  ;;  %v50_v10 = vmul.f32 %v48_v8, %v46_v6  ;;  %186 = vmatpush1.xpose.msra.mxu1 %v46_v6  ;;  %84 = vmatpush1.xpose.msra.mxu0 %v46_v6  ;;  %v461_v44 = vld [vmem:[%s724_s3] ss:$0 sm:$0xff]  ;;  %v602_v49 = vmov 1   ;;  %v603_v58 = vmov 2   ;;  %s607_s3 = smov [#allocation8]  }
  0x2a   :  { %v54_v17 = vsel %vm52_vm0, %v51_v14, 0.0  ;;  %v73_v18 = vsel %vm52_vm0, %v71_v11, 0.0  ;;  %v74_v19 = vsel %vm52_vm0, %v72_v12, 0.0  ;;  %v263_v50 = vsub.s32 0, %v664_v3  ;;  %478 = vset.pattern.permute.xlu0 %v603_v58  ;;  %s446_s20 = sshll.u32 %s607_s3, 4  ;;  %s447_s20 = int_to_ptr.vmem [resolvable:$true] %s446_s20 }
  0x2b   :  { %v667_v5 = vsub.s32 %v177_v4, %v664_v3  ;;  %v53_v16 = vsel %vm52_vm0, %v50_v10, 0.0  ;;  %v75_v22 = vadd.f32 %v74_v19, %v73_v18  ;;  %v275_v59 = vsub.s32 1, %v664_v3  ;;  %s546_s21 = scalar_lea.vmem %s447_s20, 32  ;;  %p551_p3 = scmp.lt.s32.totalorder %s447_s20, %s447_s20 }
  0x2c   :  { %v55_v21 = vadd.f32 %v54_v17, %v53_v16  ;;  %vm316_vm1 = vcmask 7168   ;;  %vm318_vm2 = vcmask 15360   ;;  %vm320_vm3 = vcmask 23552   ;;  %p547_p2 = scmp.ne.s32.totalorder %s447_s20, %s546_s21  ;;  %p552_p4 = scmp.lt.s32.totalorder %s546_s21, %s546_s21 }
  0x2d   :  { %v181_v15 = vrot.slane %v675_v13, %v667_v5  ;;  %v299_v16 = vsub.s32 3, %v664_v3  ;;  %vm322_vm4 = vcmask 31744   ;;  %v606_v23 = vmov 0.0  }
  0x2e   :  { %56 = vadd.xlane.f32.xlu0 %v55_v21  ;;  %vm159_vm6 = vcmask 46080   ;;  %vm324_vm7 = vcmask 39936   ;;  %vm336_vm8 = vcmask 48128   ;;  %vm334_vm9 = vcmask 41984   ;;  %p553_p5 = por %p552_p4, %p551_p3 }
  0x2f   :  { %v182_v20 = vcombine.high %v181_v15, %v181_v15 }
  0x30   :  { %p554_p6 = pnand %p553_p5, %p547_p2 }
  0x31   :  { %249 = vmatprep.mubr.f32.mxu1 %v182_v20 }
  0x32   :  { %250 = vmatmul.mubr.f32.vlgmr.msra.gmra.mrb[0].mxu1 %v181_v15  ;;  %76 = vadd.xlane.f32.xlu0 %v75_v22  ;;  %v605_v15 = vmov 4  }
  0xbb   :  { %v57_v24 = vpop.xlane.xlu0 %56 }
  0xbc   :  { %v59_v25 = vand.u32 2147483647, %v57_v24  ;;  %v58_v32 = vmax.f32 %v57_v24, 0.0 }
  0xbe   :  { %v60_v26 = vsub.f32 0.0, %v59_v25 }
  0xbf   :  { %v77_v30 = vpop.xlane.xlu0 %76 }
  0xc0   :  { %v61_v27 = vmul.f32 1.442695, %v60_v26  ;;  %v311_v26 = vsub.s32 4, %v664_v3 }
  0xc2   :  { %482 = vpow2.f32 %v61_v27 }
  0xcc   :  { %v483_v28 = vpop.eup %482 }
  0xcd   :  { %v63_v29 = vadd.f32 1.0, %v483_v28 }
  0xcf   :  { %484 = vlog2.f32 %v63_v29 }
  0xd0   :  { %486 = vrcp.f32 %v77_v30 }
  0xd9   :  { %v485_v31 = vpop.eup %484 }
  0xda   :  { %v65_v33 = vmul.f32 0.6931472, %v485_v31  ;;  %v487_v37 = vpop.eup %486 }
  0xdc   :  { %v66_v34 = vadd.f32 %v65_v33, %v58_v32 }
  0xde   :  { %v460_v35 = vadd.f32 -1.0, %v66_v34 }
  0xe0   :  { %v68_v36 = vsub.f32 %v460_v35, %v57_v24  ;;  %v156_v24 = vand.u32 127, %v153_v0 }
  0xe2   :  { %v69_v38 = vmul.f32 %v68_v36, %v46_v6  ;;  %v70_v39 = vmul.f32 %v68_v36, %v47_v7  ;;  %v604_v6 = vmov 3   ;;  %v287_v7 = vsub.s32 2, %v664_v3 }
  0xe3   :  { %vm157_vm5 = vcmp.eq.s32.totalorder %v664_v3, %v156_v24 }
  0xe4   :  { %v80_v40 = vmul.f32 %v487_v37, %v70_v39  ;;  %v79_v41 = vmul.f32 %v487_v37, %v69_v38 }
  0xe6   :  { %v82_v42 = vadd.f32 %v80_v40, %v49_v9  ;;  %v81_v43 = vadd.f32 %v79_v41, %v48_v8 }
  0xe8   :  { %147 = vmatprep.mubr.f32.mxu0 %v82_v42  ;;  %462 = vmatprep.subr.msk.mxu0 %vm52_vm0, %v82_v42 }
  0xe9   :  { %148 = vmatmul.mubr.f32.vlgmr.msra.gmra.mrb[0].mxu0 %v81_v43 }
  0xea   :  { %463 = vmatpush1.msk.msra.mxu0 %vm52_vm0, %v81_v43  ;;  %410 = vmatprep.mubr.f32.mxu0 %v606_v23 }
 0x105   :  { %v251_v45 = vpop.f32.mrb[0].mxu1 }
 0x106   :  { %v252_v46 = vadd.f32 %v461_v44, %v251_v45  ;;  %v253_v47 = vpop.f32.mrb[1].mxu1 }
 0x108   :  { %488 = vtanh.f32 %v252_v46 }
 0x112   :  { %v489_v48 = vpop.eup %488 }
 0x113   :  { %258 = vperm.xlu1 %476, %v489_v48  }
 0x117   :  { %477 = vset.pattern.permute.xlu1 %v602_v49 }
 0x192   :  { %v259_v52 = vpop.permute.xlu1 %258 }
 0x1bc   :  { %v149_v51 = vpop.f32.mrb[0].mxu0 }
 0x1bd   :  { %v151_v53 = vpop.f32.mrb[1].mxu0  ;;  %v264_v54 = vrot.slane %v149_v51, %v263_v50  ;;  %v276_v60 = vrot.slane %v149_v51, %v275_v59  ;;  %v288_v8 = vrot.slane %v149_v51, %v287_v7  ;;  %v300_v17 = vrot.slane %v149_v51, %v299_v16 }
 0x1be   :  { %v158_v25 = vsel %vm157_vm5, %v149_v51, 0.0  ;;  %v312_v29 = vrot.slane %v149_v51, %v311_v26 }
 0x1bf   :  { %v265_v55 = vmul.f32 %v264_v54, %v259_v52  ;;  %v160_v27 = vsel %vm159_vm6, %v158_v25, 0.0 }
 0x1c0   :  { %v161_v28 = vrot.slane %v160_v27, 4 }
 0x1c1   :  { %v266_v56 = vadd.f32 %v265_v55, %v252_v46 }
 0x1c2   :  { %v162_v32 = vadd.f32 %v161_v28, %v160_v27 }
 0x1c3   :  { %490 = vtanh.f32 %v266_v56 }
 0x1c4   :  { %v163_v34 = vrot.slane %v162_v32, 2 }
 0x1c6   :  { %v164_v35 = vadd.f32 %v163_v34, %v162_v32 }
 0x1c8   :  { %v165_v0 = vrot.slane %v164_v35, 1 }
 0x1ca   :  { %v166_v39 = vadd.f32 %v165_v0, %v164_v35 }
 0x1cd   :  { %v491_v57 = vpop.eup %490 }
 0x1ce   :  { %270 = vperm.xlu1 %477, %v491_v57   ;;  %v317_v2 = vsel %vm316_vm1, %v489_v48, %v491_v57 }
 0x1d2   :  { %479 = vset.pattern.permute.xlu1 %v604_v6 }
 0x24d   :  { %v271_v61 = vpop.permute.xlu1 %270 }
 0x24e   :  { %v277_v62 = vmul.f32 %v276_v60, %v271_v61 }
 0x250   :  { %v278_v63 = vadd.f32 %v277_v62, %v266_v56 }
 0x252   :  { %492 = vtanh.f32 %v278_v63 }
 0x25c   :  { %v493_v1 = vpop.eup %492 }
 0x25d   :  { %282 = vperm.xlu0 %478, %v493_v1   ;;  %v319_v4 = vsel %vm318_vm2, %v317_v2, %v493_v1 }
 0x261   :  { %481 = vset.pattern.permute.xlu0 %v605_v15 }
 0x2dc   :  { %v283_v9 = vpop.permute.xlu0 %282 }
 0x2dd   :  { %v289_v10 = vmul.f32 %v288_v8, %v283_v9 }
 0x2df   :  { %v290_v11 = vadd.f32 %v289_v10, %v278_v63 }
 0x2e1   :  { %494 = vtanh.f32 %v290_v11 }
 0x2eb   :  { %v495_v12 = vpop.eup %494 }
 0x2ec   :  { %294 = vperm.xlu1 %479, %v495_v12   ;;  %v321_v14 = vsel %vm320_vm3, %v319_v4, %v495_v12 }
 0x2f0   :  { %480 = vset.pattern.permute.xlu1 %v605_v15 }
 0x36b   :  { %v295_v18 = vpop.permute.xlu1 %294 }
 0x36c   :  { %v301_v19 = vmul.f32 %v300_v17, %v295_v18 }
 0x36e   :  { %v302_v20 = vadd.f32 %v301_v19, %v290_v11 }
 0x370   :  { %496 = vtanh.f32 %v302_v20 }
 0x37a   :  { %v497_v21 = vpop.eup %496 }
 0x37b   :  { %306 = vperm.xlu1 %480, %v497_v21   ;;  %v323_v22 = vsel %vm322_vm4, %v321_v14, %v497_v21 }
 0x3fa   :  { %v307_v30 = vpop.permute.xlu1 %306 }
 0x3fb   :  { %v313_v31 = vmul.f32 %v312_v29, %v307_v30 }
 0x3fd   :  { %v314_v33 = vadd.f32 %v313_v31, %v302_v20 }
 0x3ff   :  { %498 = vtanh.f32 %v314_v33 }
 0x409   :  { %v499_v36 = vpop.eup %498 }
 0x40a   :  { %v325_v37 = vsel %vm324_vm7, %v323_v22, %v499_v36 }
 0x40b   :  { %v326_v38 = vmul.f32 %v325_v37, %v325_v37  ;;  %464 = vmatmul.mubr.msk.f32.vlgmr.msra.gmra.mrb[2].mxu0 %vm336_vm8, %v325_v37 }
 0x40d   :  { %v327_v40 = vsub.f32 1.0, %v326_v38 }
 0x40f   :  { %v328_v3 = vmul.f32 %v327_v40, %v166_v39 }
 0x411   :  { %v329_v41 = vadd.f32 1.0, %v328_v3 }
 0x413   :  { %v330_v42 = vand.u32 2147483647, %v329_v41 }
 0x415   :  { %v331_v43 = vadd.f32 1e-06, %v330_v42 }
 0x417   :  { %500 = vlog2.f32 %v331_v43 }
 0x421   :  { %v501_v44 = vpop.eup %500 }
 0x422   :  { %v333_v45 = vmul.f32 0.6931472, %v501_v44 }
 0x424   :  { %335 = vst.msk [vmem:[#allocation8] sm:$0x3] %vm334_vm9, %v333_v45 }
 0x425   :  { %557 = shalt.err (!%p554_p6)
}
 0x426   :  { %s558_s24 = scalar_lea.hbm %s726_s5, 32 }
 0x427   :  { %p559_p7 = scmp.ne.s32.totalorder %s726_s5, %s558_s24  ;;  %p562_p8 = scmp.lt.u32.totalorder %s558_s24, %s726_s5 }
 0x429   :  { %p564_p9 = pnand %p562_p8, %p559_p7 }
 0x42b   :  { %567 = shalt.err (!%p564_p9)
}
 0x42c   :  { %449 = dma.vmem_to_hbm [thread:$0]  %s447_s20, 32, %s726_s5, [#allocation9]  }
 0x42d   :  { %s608_s6 = smov [#allocation7]  }
 0x42e   :  { %s436_s7 = sshll.u32 %s608_s6, 4  ;;  %s437_s7 = int_to_ptr.vmem [resolvable:$true] %s436_s7 }
 0x42f   :  { %s568_s8 = scalar_lea.vmem %s437_s7, 64  ;;  %p573_p11 = scmp.lt.s32.totalorder %s437_s7, %s437_s7 }
 0x430   :  { %p569_p10 = scmp.ne.s32.totalorder %s437_s7, %s568_s8  ;;  %p574_p12 = scmp.lt.s32.totalorder %s568_s8, %s568_s8 }
 0x432   :  { %p575_p13 = por %p574_p12, %p573_p11 }
 0x434   :  { %p576_p0 = pnand %p575_p13, %p569_p10 }
 0x4de   :  { %v412_v46 = vpop.f32.mrb[2].mxu0 }
 0x4df   :  { %v414_v47 = vpop.f32.mrb[3].mxu0 }
 0x4e0   :  { %v419_v48 = vcombine.low %v412_v46, %v414_v47 }
 0x4e2   :  { %v426_v49 = vrot.slane %v419_v48, %v667_v5 }
 0x4e4   :  { %v428_v50 = vadd.f32 %v426_v49, %v675_v13 }
 0x4e6   :  { %429 = vst [vmem:[#allocation7] sm:$0xf] %v428_v50 }
 0x4e7   :  { %579 = shalt.err (!%p576_p0)
}
 0x4e8   :  { %s580_s10 = scalar_lea.hbm %s725_s4, 64 }
 0x4e9   :  { %p581_p1 = scmp.ne.s32.totalorder %s725_s4, %s580_s10  ;;  %p584_p2 = scmp.lt.u32.totalorder %s580_s10, %s725_s4 }
 0x4eb   :  { %p586_p3 = pnand %p584_p2, %p581_p1 }
 0x4ed   :  { %589 = shalt.err (!%p586_p3)
}
 0x4ee   :  { %439 = dma.vmem_to_hbm [thread:$0]  %s437_s7, 64, %s725_s4, [#allocation4]  }
 0x4ef   :  { %594 = dma.done.wait [#allocation4], 64  }
 0x4f0   :  { %595 = vsyncadd [#allocation4], 4294967232 }
 0x4f1   :  { %596 = dma.done.wait [#allocation9], 32  }
 0x4f2   :  { %597 = vsyncadd [#allocation9], 4294967264 }
 0x4f3   :  { %456 = vsyncpa [#allocation3], 1 }
 0x4f4   :  { %457 = vsyncpa [#allocation6], 1 }
 0x4f5   :  { %458 = vsyncpa [#allocation4], 1 }
 0x4f6   :  { %459 = vsyncpa [#allocation9], 1 }

</bundles_post_ra>
